<compile_context>
chip_gen: v5e
topology: v5e:2x2
jax: 0.10.0
libtpu: 0.0.40
codegen_flags: <defaults>
</compile_context>

<pallas_src>
import jax
import jax.numpy as jnp
from jax.experimental import pallas as pl
from jax.experimental.pallas import tpu as pltpu


def _round_up(x, m):
    return ((x + m - 1) // m) * m


def make_gan_kernel(num_layers, hidden_dim, token_dim, offs):
    has_hidden = num_layers > 1
    H, D = hidden_dim, token_dim

    def kernel(x_ref, *refs):
        final_ref, disc_ref = refs[-2], refs[-1]
        it = iter(refs[:-2])
        dw0 = next(it)
        dwh = next(it) if has_hidden else None
        dwo = next(it)
        gw0 = next(it)
        gwh = next(it) if has_hidden else None
        gwo = next(it)
        bias = next(it)

        def bseg(off, rows):
            # Static, 8-row-aligned slice of the packed bias slab -> (rows, 1).
            return bias[off:off + rows, :]

        xb = x_ref[...].astype(jnp.bfloat16)                  # (D, TM) bf16

        # ---------------- Discriminator (activations are (H, TM)) -----------
        h = jnp.maximum(
            jnp.dot(dw0[...], xb, preferred_element_type=jnp.float32)
            + bseg(offs["db0"], H), 0.0)
        if has_hidden:
            for l in range(num_layers - 1):
                h = jnp.maximum(
                    jnp.dot(dwh[l], h.astype(jnp.bfloat16),
                            preferred_element_type=jnp.float32)
                    + bseg(offs["dbh"][l], H), 0.0)

        # Single head, bf16 operands, f32 accumulate -> lane-dense (1, TM).
        logits = (jnp.dot(dwo[...], h.astype(jnp.bfloat16),
                          preferred_element_type=jnp.float32)
                  + bseg(offs["dbo"], 1))                     # (1, TM)
        label = logits >= 0.0                # == sigmoid(logits) >= 0.5
        disc_ref[...] = jax.nn.sigmoid(logits)

        # ---------------- Generator (label-conditioned) ---------------------
        lf = label.astype(jnp.float32)                        # (1, TM)
        g = jnp.maximum(
            jnp.dot(gw0[...], xb, preferred_element_type=jnp.float32)
            + bseg(offs["gl0"], H) * lf + bseg(offs["gb0"], H), 0.0)
        if has_hidden:
            for l in range(num_layers - 1):
                g = jnp.maximum(
                    jnp.dot(gwh[l], g.astype(jnp.bfloat16),
                            preferred_element_type=jnp.float32)
                    + bseg(offs["gbh"][l], H), 0.0)
        denoised = (jnp.dot(gwo[...], g.astype(jnp.bfloat16),
                            preferred_element_type=jnp.float32)
                    + bseg(offs["gbo"], D))                   # (D, TM)

        # where(real, original, denoised); re-read x to keep vreg pressure low.
        final_ref[...] = jnp.where(label, x_ref[...], denoised)

    return kernel


def _flatten_params(params, num_layers):
    """Pre-transpose weights to feature-major bf16 and pack all f32 biases
    (plus the label-conditioning vector) into one 8-row-aligned (N, 1) slab.
    Returns (flat_inputs, bias_offsets)."""
    bf, f32 = jnp.bfloat16, jnp.float32
    L = num_layers

    segs, cur = [], 0
    offs = {}

    def add(a):
        nonlocal cur
        col = jnp.asarray(a, f32).reshape(1, -1).T            # (n, 1) column
        pad = (-col.shape[0]) % 8
        if pad:
            col = jnp.pad(col, ((0, pad), (0, 0)))
        off = cur
        segs.append(col)
        cur += col.shape[0]
        return off

    offs["db0"] = add(params["db0"])
    if L > 1:
        offs["dbh"] = [add(params["dbh"][l]) for l in range(L - 1)]
    offs["dbo"] = add(params["dbo"])
    offs["gb0"] = add(params["gb0"])
    offs["gl0"] = add(params["gl0"])
    if L > 1:
        offs["gbh"] = [add(params["gbh"][l]) for l in range(L - 1)]
    offs["gbo"] = add(params["gbo"])
    bias_slab = jnp.concatenate(segs, axis=0)                 # (N, 1) f32

    flat = [params["dw0"].T.astype(bf)]                       # (H, D)
    if L > 1:
        flat.append(jnp.swapaxes(params["dwh"], 1, 2).astype(bf))   # (L-1, H, H)
    flat.append(params["dwo"].T.astype(bf))                   # (1, H)
    flat.append(params["gw0"].T.astype(bf))                   # (H, D)
    if L > 1:
        flat.append(jnp.swapaxes(params["gwh"], 1, 2).astype(bf))   # (L-1, H, H)
    flat.append(params["gwo"].T.astype(bf))                   # (D, H)
    flat.append(bias_slab)
    return flat, offs


def gan_forward(tokens, params, num_layers, *, tile_m=1024):
    """tokens: (B, S, D) f32 -> (final_tokens (B,S,D), disc_out (B,S,1))."""
    B, S, D = tokens.shape
    H = params["dw0"].shape[1]
    M = B * S

    # Feature-major input: (D, M) with tokens on the 128-lane axis.
    x_t = tokens.reshape(M, D).astype(jnp.float32).T

    # Tile sizing: lane axis must be a multiple of 128; clamp for tiny M, and
    # prefer an even tile count so v7x's two TensorCores split the "parallel"
    # grid axis evenly.
    tile_m = _round_up(max(128, min(tile_m, _round_up(M, 128))), 128)
    n_tiles = pl.cdiv(M, tile_m)
    if n_tiles > 1 and n_tiles % 2 == 1:
        tile_alt = _round_up(pl.cdiv(M, n_tiles + 1), 128)
        if pl.cdiv(M, tile_alt) % 2 == 0:
            tile_m = tile_alt
            n_tiles = pl.cdiv(M, tile_alt)
    M_pad = n_tiles * tile_m
    if M_pad != M:
        x_t = jnp.pad(x_t, ((0, 0), (0, M_pad - M)))

    flat_params, offs = _flatten_params(params, num_layers)
    kernel = make_gan_kernel(num_layers, H, D, offs)

    in_specs = [pl.BlockSpec((D, tile_m), lambda i: (0, i))]
    for p in flat_params:
        # Whole-array blocks with constant index maps -> fetched once and
        # resident across the grid.  (If D/H are scaled up, add
        # pipeline_mode=pl.Buffered(1) here and set vmem_limit_bytes so the
        # resident weight stacks fit v7x's 64 MiB VMEM.)
        in_specs.append(pl.BlockSpec(p.shape, lambda i, _nd=p.ndim: (0,) * _nd))

    out_specs = [
        pl.BlockSpec((D, tile_m), lambda i: (0, i)),   # final tokens (lane-dense)
        pl.BlockSpec((1, tile_m), lambda i: (0, i)),   # disc probabilities
    ]

    final_t, disc_row = pl.pallas_call(
        kernel,
        out_shape=(
            jax.ShapeDtypeStruct((D, M_pad), jnp.float32),
            jax.ShapeDtypeStruct((1, M_pad), jnp.float32),
        ),
        grid_spec=pltpu.PrefetchScalarGridSpec(
            num_scalar_prefetch=0,
            grid=(n_tiles,),
            in_specs=in_specs,
            out_specs=out_specs,
        ),
        compiler_params=pltpu.CompilerParams(
            dimension_semantics=("parallel",)),
    )(x_t, *flat_params)

    final = final_t[:, :M].T.reshape(B, S, D)
    disc = disc_row[0, :M].reshape(B, S, 1)
    return final, disc


def init_params(key, token_dim, hidden_dim, num_layers):
    keys = iter(jax.random.split(key, 64))

    def lin(k, shape, scale=0.2):
        return jax.random.normal(k, shape, jnp.float32) * scale

    params = {
        "dw0": lin(next(keys), (token_dim, hidden_dim)),
        "db0": jnp.full((1, hidden_dim), 0.01, jnp.float32),
        "dwo": lin(next(keys), (hidden_dim, 1)),
        "dbo": jnp.zeros((1, 1), jnp.float32),
        "gw0": lin(next(keys), (token_dim, hidden_dim)),
        "gb0": jnp.full((1, hidden_dim), 0.01, jnp.float32),
        "gl0": lin(next(keys), (1, hidden_dim)),       # label-conditioning weights
        "gwo": lin(next(keys), (hidden_dim, token_dim)),
        "gbo": jnp.zeros((1, token_dim), jnp.float32),
    }
    if num_layers > 1:
        params["dwh"] = jnp.stack(
            [lin(next(keys), (hidden_dim, hidden_dim)) for _ in range(num_layers - 1)])
        params["dbh"] = jnp.full((num_layers - 1, 1, hidden_dim), 0.01, jnp.float32)
        params["gwh"] = jnp.stack(
            [lin(next(keys), (hidden_dim, hidden_dim)) for _ in range(num_layers - 1)])
        params["gbh"] = jnp.full((num_layers - 1, 1, hidden_dim), 0.01, jnp.float32)
    return params


def reference_forward(tokens, params, num_layers):
    """Pure-JAX reference mirroring the kernel math (bf16 matmuls incl. the
    discriminator head, f32 accumulation / elementwise)."""
    B, S, D = tokens.shape
    x = tokens.reshape(-1, D).astype(jnp.float32)
    bf = jnp.bfloat16

    def mm(a, w):
        return jnp.dot(a.astype(bf), w.astype(bf),
                       preferred_element_type=jnp.float32)

    h = jnp.maximum(mm(x, params["dw0"]) + params["db0"], 0.0)
    for l in range(num_layers - 1):
        h = jnp.maximum(mm(h, params["dwh"][l]) + params["dbh"][l], 0.0)
    logits = mm(h, params["dwo"]) + params["dbo"]
    p = jax.nn.sigmoid(logits)
    label = logits >= 0.0                     # == sigmoid >= 0.5 (matches torch >= 0.5)
    lf = label.astype(jnp.float32)

    g = jnp.maximum(mm(x, params["gw0"]) + lf * params["gl0"] + params["gb0"], 0.0)
    for l in range(num_layers - 1):
        g = jnp.maximum(mm(g, params["gwh"][l]) + params["gbh"][l], 0.0)
    den = mm(g, params["gwo"]) + params["gbo"]
    final = jnp.where(label, x, den)
    return final.reshape(B, S, D), p.reshape(B, S, 1)


if __name__ == "__main__":
    # Small shapes consistent with the module: (batch, seq_len, token_dim)
    B, S, TOKEN_DIM, HIDDEN_DIM, NUM_LAYERS = 2, 8, 16, 32, 2

    key = jax.random.PRNGKey(0)
    k_tok, k_par, k_tok2 = jax.random.split(key, 3)
    tokens = jax.random.normal(k_tok, (B, S, TOKEN_DIM), jnp.float32)
    params = init_params(k_par, TOKEN_DIM, HIDDEN_DIM, NUM_LAYERS)

    final_tokens, disc_out = gan_forward(tokens, params, NUM_LAYERS)
    final_tokens = jax.block_until_ready(final_tokens)
    disc_out = jax.block_until_ready(disc_out)

    ref_final, ref_disc = reference_forward(tokens, params, NUM_LAYERS)
    assert final_tokens.shape == (B, S, TOKEN_DIM)
    assert disc_out.shape == (B, S, 1)
    assert jnp.allclose(final_tokens, ref_final, atol=5e-3, rtol=5e-3)
    assert jnp.allclose(disc_out, ref_disc, atol=5e-3, rtol=5e-3)

    # Larger run: 1200 rows -> two 1024-wide feature-major tiles (even tile
    # count for v7x megacore), zero-padded, multi-step "parallel" grid.
    B2, S2 = 4, 300
    tokens2 = jax.random.normal(k_tok2, (B2, S2, TOKEN_DIM), jnp.float32)
    final2, disc2 = gan_forward(tokens2, params, NUM_LAYERS)
    final2 = jax.block_until_ready(final2)
    disc2 = jax.block_until_ready(disc2)
    ref_final2, ref_disc2 = reference_forward(tokens2, params, NUM_LAYERS)
    assert jnp.allclose(final2, ref_final2, atol=5e-3, rtol=5e-3)
    assert jnp.allclose(disc2, ref_disc2, atol=5e-3, rtol=5e-3)

    print("KERNEL_OK")
</pallas_src>

<mosaic_0001>
module attributes {stable_mosaic.version = 11 : i64} {
  func.func @kernel(%arg0: i32, %arg1: memref<16x128xf32, #tpu.memory_space<vmem>>, %arg2: memref<32x16xbf16, #tpu.memory_space<vmem>>, %arg3: memref<1x32x32xbf16, #tpu.memory_space<vmem>>, %arg4: memref<1x32xbf16, #tpu.memory_space<vmem>>, %arg5: memref<32x16xbf16, #tpu.memory_space<vmem>>, %arg6: memref<1x32x32xbf16, #tpu.memory_space<vmem>>, %arg7: memref<16x32xbf16, #tpu.memory_space<vmem>>, %arg8: memref<184x1xf32, #tpu.memory_space<vmem>>, %arg9: memref<16x128xf32, #tpu.memory_space<vmem>>, %arg10: memref<1x128xf32, #tpu.memory_space<vmem>>) attributes {dimension_semantics = [#tpu.dimension_semantics<parallel>], iteration_bounds = array<i64: 1>, scalar_prefetch = 0 : i64, scratch_operands = 0 : i64, tpu.core_type = #tpu.core_type<tc>, window_params = [{transform_indices = @transform_0, window_bounds = array<i64: 16, 128>}, {pipeline_mode = #tpu.pipeline_mode<synchronous>, transform_indices = @transform_1, window_bounds = array<i64: 32, 16>}, {pipeline_mode = #tpu.pipeline_mode<synchronous>, transform_indices = @transform_2, window_bounds = array<i64: 1, 32, 32>}, {pipeline_mode = #tpu.pipeline_mode<synchronous>, transform_indices = @transform_3, window_bounds = array<i64: 1, 32>}, {pipeline_mode = #tpu.pipeline_mode<synchronous>, transform_indices = @transform_4, window_bounds = array<i64: 32, 16>}, {pipeline_mode = #tpu.pipeline_mode<synchronous>, transform_indices = @transform_5, window_bounds = array<i64: 1, 32, 32>}, {pipeline_mode = #tpu.pipeline_mode<synchronous>, transform_indices = @transform_6, window_bounds = array<i64: 16, 32>}, {pipeline_mode = #tpu.pipeline_mode<synchronous>, transform_indices = @transform_7, window_bounds = array<i64: 184, 1>}, {transform_indices = @transform_8, window_bounds = array<i64: 16, 128>}, {transform_indices = @transform_9, window_bounds = array<i64: 1, 128>}]} {
    %c0 = arith.constant 0 : index
    %c0_0 = arith.constant 0 : index
    %0 = vector.load %arg1[%c0, %c0_0] : memref<16x128xf32, #tpu.memory_space<vmem>>, vector<16x128xf32>
    %1 = arith.truncf %0 : vector<16x128xf32> to vector<16x128xbf16>
    %c0_1 = arith.constant 0 : index
    %c0_2 = arith.constant 0 : index
    %2 = vector.load %arg2[%c0_1, %c0_2] : memref<32x16xbf16, #tpu.memory_space<vmem>>, vector<32x16xbf16>
    %cst = arith.constant dense<0.000000e+00> : vector<32x128xf32>
    %3 = tpu.matmul %2, %1, %cst {dimension_numbers = #tpu.dot_dimension_numbers<[1], [0], [0], [1], [0, 0, 1, 1], [], []>} : vector<32x16xbf16>, vector<16x128xbf16>, vector<32x128xf32> -> vector<32x128xf32>
    %c0_3 = arith.constant 0 : index
    %c0_4 = arith.constant 0 : index
    %4 = vector.load %arg8[%c0_3, %c0_4] : memref<184x1xf32, #tpu.memory_space<vmem>>, vector<32x1xf32>
    %5 = vector.broadcast %4 : vector<32x1xf32> to vector<32x128xf32>
    %6 = arith.addf %3, %5 : vector<32x128xf32>
    %cst_5 = arith.constant 0.000000e+00 : f32
    %7 = vector.broadcast %cst_5 : f32 to vector<32x128xf32>
    %8 = arith.maximumf %6, %7 : vector<32x128xf32>
    %c0_6 = arith.constant 0 : index
    %c0_7 = arith.constant 0 : index
    %c0_8 = arith.constant 0 : index
    %9 = vector.load %arg3[%c0_6, %c0_7, %c0_8] : memref<1x32x32xbf16, #tpu.memory_space<vmem>>, vector<1x32x32xbf16>
    %10 = vector.shape_cast %9 : vector<1x32x32xbf16> to vector<32x32xbf16>
    %11 = arith.truncf %8 : vector<32x128xf32> to vector<32x128xbf16>
    %cst_9 = arith.constant dense<0.000000e+00> : vector<32x128xf32>
    %12 = tpu.matmul %10, %11, %cst_9 {dimension_numbers = #tpu.dot_dimension_numbers<[1], [0], [0], [1], [0, 0, 1, 1], [], []>} : vector<32x32xbf16>, vector<32x128xbf16>, vector<32x128xf32> -> vector<32x128xf32>
    %c32 = arith.constant 32 : index
    %c0_10 = arith.constant 0 : index
    %13 = vector.load %arg8[%c32, %c0_10] : memref<184x1xf32, #tpu.memory_space<vmem>>, vector<32x1xf32>
    %14 = vector.broadcast %13 : vector<32x1xf32> to vector<32x128xf32>
    %15 = arith.addf %12, %14 : vector<32x128xf32>
    %cst_11 = arith.constant 0.000000e+00 : f32
    %16 = vector.broadcast %cst_11 : f32 to vector<32x128xf32>
    %17 = arith.maximumf %15, %16 : vector<32x128xf32>
    %c0_12 = arith.constant 0 : index
    %c0_13 = arith.constant 0 : index
    %18 = vector.load %arg4[%c0_12, %c0_13] : memref<1x32xbf16, #tpu.memory_space<vmem>>, vector<1x32xbf16>
    %19 = arith.truncf %17 : vector<32x128xf32> to vector<32x128xbf16>
    %cst_14 = arith.constant dense<0.000000e+00> : vector<1x128xf32>
    %20 = tpu.matmul %18, %19, %cst_14 {dimension_numbers = #tpu.dot_dimension_numbers<[1], [0], [0], [1], [0, 0, 1, 1], [], []>} : vector<1x32xbf16>, vector<32x128xbf16>, vector<1x128xf32> -> vector<1x128xf32>
    %c64 = arith.constant 64 : index
    %c0_15 = arith.constant 0 : index
    %21 = vector.load %arg8[%c64, %c0_15] : memref<184x1xf32, #tpu.memory_space<vmem>>, vector<1x1xf32>
    %22 = vector.broadcast %21 : vector<1x1xf32> to vector<1x128xf32>
    %23 = arith.addf %20, %22 : vector<1x128xf32>
    %cst_16 = arith.constant 0.000000e+00 : f32
    %24 = vector.broadcast %cst_16 : f32 to vector<1x128xf32>
    %25 = arith.cmpf oge, %23, %24 : vector<1x128xf32>
    %26 = arith.negf %23 : vector<1x128xf32>
    %27 = math.exp %26 : vector<1x128xf32>
    %cst_17 = arith.constant 1.000000e+00 : f32
    %28 = vector.broadcast %cst_17 : f32 to vector<1x128xf32>
    %29 = arith.addf %28, %27 : vector<1x128xf32>
    %30 = arith.divf %28, %29 : vector<1x128xf32>
    %c0_18 = arith.constant 0 : index
    %c0_19 = arith.constant 0 : index
    %31 = vector.load %arg10[%c0_18, %c0_19] : memref<1x128xf32, #tpu.memory_space<vmem>>, vector<1x128xf32>
    tpu.vector_store %arg10[%c0_18, %c0_19], %30 {strides = array<i32>} : memref<1x128xf32, #tpu.memory_space<vmem>>, vector<1x128xf32>,
    %32 = arith.extui %25 : vector<1x128xi1> to vector<1x128xi32>
    %33 = arith.sitofp %32 : vector<1x128xi32> to vector<1x128xf32>
    %c0_20 = arith.constant 0 : index
    %c0_21 = arith.constant 0 : index
    %34 = vector.load %arg5[%c0_20, %c0_21] : memref<32x16xbf16, #tpu.memory_space<vmem>>, vector<32x16xbf16>
    %cst_22 = arith.constant dense<0.000000e+00> : vector<32x128xf32>
    %35 = tpu.matmul %34, %1, %cst_22 {dimension_numbers = #tpu.dot_dimension_numbers<[1], [0], [0], [1], [0, 0, 1, 1], [], []>} : vector<32x16xbf16>, vector<16x128xbf16>, vector<32x128xf32> -> vector<32x128xf32>
    %c104 = arith.constant 104 : index
    %c0_23 = arith.constant 0 : index
    %36 = vector.load %arg8[%c104, %c0_23] : memref<184x1xf32, #tpu.memory_space<vmem>>, vector<32x1xf32>
    %37 = vector.broadcast %36 : vector<32x1xf32> to vector<32x128xf32>
    %38 = vector.broadcast %33 : vector<1x128xf32> to vector<32x128xf32>
    %39 = arith.mulf %37, %38 : vector<32x128xf32>
    %40 = arith.addf %35, %39 : vector<32x128xf32>
    %c72 = arith.constant 72 : index
    %c0_24 = arith.constant 0 : index
    %41 = vector.load %arg8[%c72, %c0_24] : memref<184x1xf32, #tpu.memory_space<vmem>>, vector<32x1xf32>
    %42 = vector.broadcast %41 : vector<32x1xf32> to vector<32x128xf32>
    %43 = arith.addf %40, %42 : vector<32x128xf32>
    %cst_25 = arith.constant 0.000000e+00 : f32
    %44 = vector.broadcast %cst_25 : f32 to vector<32x128xf32>
    %45 = arith.maximumf %43, %44 : vector<32x128xf32>
    %c0_26 = arith.constant 0 : index
    %c0_27 = arith.constant 0 : index
    %c0_28 = arith.constant 0 : index
    %46 = vector.load %arg6[%c0_26, %c0_27, %c0_28] : memref<1x32x32xbf16, #tpu.memory_space<vmem>>, vector<1x32x32xbf16>
    %47 = vector.shape_cast %46 : vector<1x32x32xbf16> to vector<32x32xbf16>
    %48 = arith.truncf %45 : vector<32x128xf32> to vector<32x128xbf16>
    %cst_29 = arith.constant dense<0.000000e+00> : vector<32x128xf32>
    %49 = tpu.matmul %47, %48, %cst_29 {dimension_numbers = #tpu.dot_dimension_numbers<[1], [0], [0], [1], [0, 0, 1, 1], [], []>} : vector<32x32xbf16>, vector<32x128xbf16>, vector<32x128xf32> -> vector<32x128xf32>
    %c136 = arith.constant 136 : index
    %c0_30 = arith.constant 0 : index
    %50 = vector.load %arg8[%c136, %c0_30] : memref<184x1xf32, #tpu.memory_space<vmem>>, vector<32x1xf32>
    %51 = vector.broadcast %50 : vector<32x1xf32> to vector<32x128xf32>
    %52 = arith.addf %49, %51 : vector<32x128xf32>
    %cst_31 = arith.constant 0.000000e+00 : f32
    %53 = vector.broadcast %cst_31 : f32 to vector<32x128xf32>
    %54 = arith.maximumf %52, %53 : vector<32x128xf32>
    %c0_32 = arith.constant 0 : index
    %c0_33 = arith.constant 0 : index
    %55 = vector.load %arg7[%c0_32, %c0_33] : memref<16x32xbf16, #tpu.memory_space<vmem>>, vector<16x32xbf16>
    %56 = arith.truncf %54 : vector<32x128xf32> to vector<32x128xbf16>
    %cst_34 = arith.constant dense<0.000000e+00> : vector<16x128xf32>
    %57 = tpu.matmul %55, %56, %cst_34 {dimension_numbers = #tpu.dot_dimension_numbers<[1], [0], [0], [1], [0, 0, 1, 1], [], []>} : vector<16x32xbf16>, vector<32x128xbf16>, vector<16x128xf32> -> vector<16x128xf32>
    %c168 = arith.constant 168 : index
    %c0_35 = arith.constant 0 : index
    %58 = vector.load %arg8[%c168, %c0_35] : memref<184x1xf32, #tpu.memory_space<vmem>>, vector<16x1xf32>
    %59 = vector.broadcast %58 : vector<16x1xf32> to vector<16x128xf32>
    %60 = arith.addf %57, %59 : vector<16x128xf32>
    %c0_36 = arith.constant 0 : index
    %c0_37 = arith.constant 0 : index
    %61 = vector.load %arg1[%c0_36, %c0_37] : memref<16x128xf32, #tpu.memory_space<vmem>>, vector<16x128xf32>
    %62 = vector.shape_cast %25 : vector<1x128xi1> to vector<1x128xi1>
    %63 = vector.broadcast %62 : vector<1x128xi1> to vector<16x128xi1>
    %64 = arith.select %63, %61, %60 : vector<16x128xi1>, vector<16x128xf32>
    %c0_38 = arith.constant 0 : index
    %c0_39 = arith.constant 0 : index
    %65 = vector.load %arg9[%c0_38, %c0_39] : memref<16x128xf32, #tpu.memory_space<vmem>>, vector<16x128xf32>
    tpu.vector_store %arg9[%c0_38, %c0_39], %64 {strides = array<i32>} : memref<16x128xf32, #tpu.memory_space<vmem>>, vector<16x128xf32>,
    return
  }
  func.func @transform_0(%arg0: i32) -> (i32, i32) {
    %c0_i32 = arith.constant 0 : i32
    %c0_i32_0 = arith.constant 0 : i32
    return %c0_i32, %arg0 : i32, i32
  }
  func.func @transform_1(%arg0: i32) -> (i32, i32) {
    %c0_i32 = arith.constant 0 : i32
    %c0_i32_0 = arith.constant 0 : i32
    %c0_i32_1 = arith.constant 0 : i32
    return %c0_i32, %c0_i32_0 : i32, i32
  }
  func.func @transform_2(%arg0: i32) -> (i32, i32, i32) {
    %c0_i32 = arith.constant 0 : i32
    %c0_i32_0 = arith.constant 0 : i32
    %c0_i32_1 = arith.constant 0 : i32
    %c0_i32_2 = arith.constant 0 : i32
    return %c0_i32, %c0_i32_0, %c0_i32_1 : i32, i32, i32
  }
  func.func @transform_3(%arg0: i32) -> (i32, i32) {
    %c0_i32 = arith.constant 0 : i32
    %c0_i32_0 = arith.constant 0 : i32
    %c0_i32_1 = arith.constant 0 : i32
    return %c0_i32, %c0_i32_0 : i32, i32
  }
  func.func @transform_4(%arg0: i32) -> (i32, i32) {
    %c0_i32 = arith.constant 0 : i32
    %c0_i32_0 = arith.constant 0 : i32
    %c0_i32_1 = arith.constant 0 : i32
    return %c0_i32, %c0_i32_0 : i32, i32
  }
  func.func @transform_5(%arg0: i32) -> (i32, i32, i32) {
    %c0_i32 = arith.constant 0 : i32
    %c0_i32_0 = arith.constant 0 : i32
    %c0_i32_1 = arith.constant 0 : i32
    %c0_i32_2 = arith.constant 0 : i32
    return %c0_i32, %c0_i32_0, %c0_i32_1 : i32, i32, i32
  }
  func.func @transform_6(%arg0: i32) -> (i32, i32) {
    %c0_i32 = arith.constant 0 : i32
    %c0_i32_0 = arith.constant 0 : i32
    %c0_i32_1 = arith.constant 0 : i32
    return %c0_i32, %c0_i32_0 : i32, i32
  }
  func.func @transform_7(%arg0: i32) -> (i32, i32) {
    %c0_i32 = arith.constant 0 : i32
    %c0_i32_0 = arith.constant 0 : i32
    %c0_i32_1 = arith.constant 0 : i32
    return %c0_i32, %c0_i32_0 : i32, i32
  }
  func.func @transform_8(%arg0: i32) -> (i32, i32) {
    %c0_i32 = arith.constant 0 : i32
    %c0_i32_0 = arith.constant 0 : i32
    return %c0_i32, %arg0 : i32, i32
  }
  func.func @transform_9(%arg0: i32) -> (i32, i32) {
    %c0_i32 = arith.constant 0 : i32
    %c0_i32_0 = arith.constant 0 : i32
    return %c0_i32, %arg0 : i32, i32
  }
}

</mosaic_0001>

<bundles_post_ra>
// kernel: tpu_custom_call.1
= control target key start
LH: loop header
LB: loop body
LE: loop exit
PB: predicated region body
PF: predicated region fallthrough
CT: control target
= control target key end

     0   :  { %15 = vsyncpa [#allocation3], 0  ;;  %v596_v3 = vmov 0   ;;  %vm75_vm0 = vcmask 130048   ;;  %s793_s0 = inlined_call_operand.vmem [shape: f32[16,128], index: 0, kind: input, shape index: {}]   ;;  %s794_s1 = inlined_call_operand.vmem [shape: bf16[32,16], index: 1, kind: input, shape index: {}]   ;;  %s795_s2 = inlined_call_operand.vmem [shape: bf16[1,32,32], index: 2, kind: input, shape index: {}]   ;;  %s796_s3 = inlined_call_operand.vmem [shape: bf16[1,32], index: 3, kind: input, shape index: {}]   ;;  %s797_s4 = inlined_call_operand.vmem [shape: bf16[32,16], index: 4, kind: input, shape index: {}]   ;;  %s798_s5 = inlined_call_operand.vmem [shape: bf16[1,32,32], index: 5, kind: input, shape index: {}]   ;;  %s799_s6 = inlined_call_operand.vmem [shape: bf16[16,32], index: 6, kind: input, shape index: {}]   ;;  %s800_s7 = inlined_call_operand.vmem [shape: f32[184,1], index: 7, kind: input, shape index: {}]   ;;  %s801_s8 = inlined_call_operand.hbm [shape: f32[16,128], index: 8, kind: output, shape index: {0}]   ;;  %s802_s9 = inlined_call_operand.hbm [shape: f32[1,128], index: 9, kind: output, shape index: {1}]  }
   0x1   :  { %v43_v0 = vld [vmem:[%s800_s7 + $0x10] sm:$0xff]  ;;  %v41_v1 = vld [vmem:[%s800_s7] sm:$0xff]  ;;  %538 = vset.pattern.permute.xlu1 %v596_v3  ;;  %537 = vset.pattern.permute.xlu0 %v596_v3  ;;  %v668_v4 = vld [vmem:[%s793_s0 + $0x8] sm:$0xff] }
   0x2   :  { %v661_v2 = vld [vmem:[%s793_s0] sm:$0xff]  ;;  %57 = vperm.xlu0 %537, %v43_v0   ;;  %47 = vperm.xlu1 %538, %v41_v1  }
   0x3   :  { %v36_v5 = vpack.c.bf16 %v668_v4, %v661_v2  ;;  %v520_v6 = vld [vmem:[%s794_s1] sm:$0xff]  ;;  %539 = vset.pattern.permute.xlu2 %v596_v3 }
   0x5   :  { %89 = vmatpush.bf16.msra.mxu0 %v36_v5  ;;  %279 = vmatpush.bf16.msra.mxu3 %v36_v5 }
   0x6   :  { %16 = vsyncpa [#allocation5], 0  ;;  %v44_v7 = vld [vmem:[%s800_s7 + $0x18] sm:$0xff]  ;;  %v42_v8 = vld [vmem:[%s800_s7 + $0x8] sm:$0xff]  ;;  %vm145_vm1 = vcmask 261120   ;;  %s598_s27 = smov [#allocation4]  }
   0x7   :  { %v111_v9 = vld [vmem:[%s800_s7 + $0x20] sm:$0xff]  ;;  %v112_v10 = vld [vmem:[%s800_s7 + $0x28] sm:$0xff]  ;;  %v229_v12 = vld [vmem:[%s800_s7 + $0x78] sm:$0xff]  ;;  %s456_s28 = sshll.u32 %s598_s27, 4  ;;  %s458_s10 = sshll.u32 %s802_s9, 4  ;;  %s457_s28 = int_to_ptr.vmem [resolvable:$true] %s456_s28  ;;  %s459_s10 = int_to_ptr.hbm [resolvable:$true] %s458_s10 }
   0x8   :  { %480 = vmatmul.msk.bf16.vlgmr.msra.gmra.mxu0 %vm75_vm0, %v520_v6  ;;  %v521_v11 = vld [vmem:[%s794_s1 + $0x8] sm:$0xff]  ;;  %v230_v13 = vld [vmem:[%s800_s7 + $0x80] sm:$0xff]  ;;  %v228_v14 = vld [vmem:[%s800_s7 + $0x70] sm:$0xff]  ;;  %s444_s9 = sshll.u32 %s801_s8, 4  ;;  %s600_s14 = smov 128   ;;  %s445_s9 = int_to_ptr.hbm [resolvable:$true] %s444_s9 }
   0x9   :  { %v293_v15 = vld [vmem:[%s800_s7 + $0x58] sm:$0xff]  ;;  %v291_v16 = vld [vmem:[%s800_s7 + $0x48] sm:$0xff]  ;;  %v292_v17 = vld [vmem:[%s800_s7 + $0x50] sm:$0xff]  ;;  %s601_s1 = smov 8  }
   0xa   :  { %62 = vperm.xlu0 %537, %v44_v7   ;;  %52 = vperm.xlu1 %538, %v42_v8   ;;  %v332_v18 = vld [vmem:[%s800_s7 + $0xa0] sm:$0xff]  ;;  %v329_v19 = vld [vmem:[%s800_s7 + $0x88] sm:$0xff]  ;;  %v397_v21 = vld [vmem:[%s800_s7 + $0xb0] sm:$0xff] }
   0xb   :  { %v396_v20 = vld [vmem:[%s800_s7 + $0xa8] sm:$0xff]  ;;  %v113_v23 = vld [vmem:[%s800_s7 + $0x30] sm:$0xff]  ;;  %v114_v25 = vld [vmem:[%s800_s7 + $0x38] sm:$0xff] }
   0xc   :  { %127 = vperm.xlu2 %539, %v113_v23   ;;  %v178_v29 = vld [vmem:[%s800_s7 + $0x40] sm:$0x1]  ;;  %v227_v39 = vld [vmem:[%s800_s7 + $0x68] sm:$0xff]  ;;  %v331_v46 = vld [vmem:[%s800_s7 + $0x98] sm:$0xff] }
   0xd   :  { %v522_v44 = vld [vmem:[%s795_s2] sm:$0xff]  ;;  %v523_v47 = vld [vmem:[%s795_s2 + $0x8] sm:$0xff]  ;;  %v330_v48 = vld [vmem:[%s800_s7 + $0x90] sm:$0xff] }
   0xe   :  { %v294_v45 = vld [vmem:[%s800_s7 + $0x60] sm:$0xff]  ;;  %v525_v50 = vld [vmem:[%s797_s4 + $0x8] sm:$0xff] }
   0xf   :  { %v524_v49 = vld [vmem:[%s797_s4] sm:$0xff] }
  0x10   :  { %503 = vmatmul.msk.bf16.vlgmr.msra.gmra.mxu3 %vm75_vm0, %v524_v49  ;;  %v175_v8 = vld [vmem:[%s796_s3] sm:$0x1] }
  0x12   :  { %117 = vperm.xlu0 %537, %v111_v9   ;;  %122 = vperm.xlu1 %538, %v112_v10  }
  0x14   :  { %132 = vperm.xlu2 %539, %v114_v25  }
  0x18   :  { %481 = vmatmul.msk.bf16.gmra.mxu0 %vm75_vm0, %v521_v11 }
  0x1a   :  { %243 = vperm.xlu0 %537, %v229_v12   ;;  %248 = vperm.xlu1 %538, %v230_v13  }
  0x1c   :  { %181 = vperm.xlu2 %539, %v178_v29  }
  0x20   :  { %504 = vmatmul.msk.bf16.gmra.mxu3 %vm75_vm0, %v525_v50  ;;  %v526_v50 = vld [vmem:[%s798_s5] sm:$0xff] }
  0x22   :  { %238 = vperm.xlu0 %537, %v228_v14   ;;  %307 = vperm.xlu1 %538, %v293_v15  }
  0x24   :  { %233 = vperm.xlu2 %539, %v227_v39  }
  0x2a   :  { %297 = vperm.xlu0 %537, %v291_v16   ;;  %302 = vperm.xlu1 %538, %v292_v17  }
  0x2c   :  { %312 = vperm.xlu2 %539, %v294_v45  }
  0x32   :  { %350 = vperm.xlu0 %537, %v332_v18   ;;  %335 = vperm.xlu1 %538, %v329_v19  }
  0x34   :  { %345 = vperm.xlu2 %539, %v331_v46  }
  0x3a   :  { %400 = vperm.xlu0 %537, %v396_v20   ;;  %405 = vperm.xlu1 %538, %v397_v21   ;;  %v597_v21 = vmov 0.0  }
  0x3c   :  { %340 = vperm.xlu2 %539, %v330_v48  }
  0x66   :  { %v128_v53 = vpop.permute.xlu2 %127 }
  0x6e   :  { %v133_v57 = vpop.permute.xlu2 %132 }
  0x74   :  { %v58_v26 = vpop.permute.xlu0 %57  ;;  %v48_v27 = vpop.permute.xlu1 %47 }
  0x76   :  { %v182_v12 = vpop.permute.xlu2 %181 }
  0x7c   :  { %v63_v30 = vpop.permute.xlu0 %62  ;;  %v53_v32 = vpop.permute.xlu1 %52 }
  0x7e   :  { %v234_v16 = vpop.permute.xlu2 %233 }
  0x84   :  { %v123_v55 = vpop.permute.xlu1 %122  ;;  %v118_v61 = vpop.permute.xlu0 %117 }
  0x85   :  { %v91_v22 = vpop.f32.mrf.mxu0 }
  0x86   :  { %v92_v36 = vadd.f32 %v91_v22, %v48_v27 }
  0x88   :  { %v101_v42 = vmax.f32 %v92_v36, 0.0 }
  0x8c   :  { %v244_v11 = vpop.permute.xlu0 %243  ;;  %v249_v13 = vpop.permute.xlu1 %248 }
  0x8d   :  { %v93_v24 = vpop.f32.mrf.mxu0 }
  0x8e   :  { %v94_v34 = vadd.f32 %v93_v24, %v53_v32 }
  0x90   :  { %v102_v40 = vmax.f32 %v94_v34, 0.0  ;;  %v313_v34 = vpop.permute.xlu2 %312 }
  0x92   :  { %v109_v43 = vpack.c.bf16 %v102_v40, %v101_v42 }
  0x93   :  { %v281_v9 = vpop.f32.mrf.mxu3 }
  0x94   :  { %v239_v15 = vpop.permute.xlu0 %238  ;;  %v308_v18 = vpop.permute.xlu1 %307 }
  0x95   :  { %v96_v28 = vpop.f32.mrf.mxu0 }
  0x96   :  { %v97_v31 = vadd.f32 %v96_v28, %v58_v26 }
  0x98   :  { %v103_v37 = vmax.f32 %v97_v31, 0.0 }
  0x9b   :  { %v283_v10 = vpop.f32.mrf.mxu3 }
  0x9d   :  { %v98_v33 = vpop.f32.mrf.mxu0 }
  0x9e   :  { %v99_v35 = vadd.f32 %v98_v33, %v63_v30  ;;  %v298_v33 = vpop.permute.xlu0 %297 }
  0xa0   :  { %v104_v38 = vmax.f32 %v99_v35, 0.0 }
  0xa2   :  { %v110_v41 = vpack.c.bf16 %v104_v38, %v103_v37  ;;  %v303_v37 = vpop.permute.xlu1 %302 }
  0xa3   :  { %v286_v14 = vpop.f32.mrf.mxu3 }
  0xa4   :  { %158 = vmatpush.bf16.msra.mxu1 %v110_v41 }
  0xa8   :  { %159 = vmatpush.bf16.msra.mxu1 %v109_v43 }
  0xab   :  { %490 = vmatmul.msk.bf16.vlgmr.msra.gmra.mxu1 %vm145_vm1, %v522_v44  ;;  %v288_v27 = vpop.f32.mrf.mxu3 }
  0xbb   :  { %491 = vmatmul.msk.bf16.gmra.mxu1 %vm145_vm1, %v523_v47 }
 0x128   :  { %v161_v51 = vpop.f32.mrf.mxu1 }
 0x129   :  { %v162_v62 = vadd.f32 %v161_v51, %v118_v61  ;;  %v527_v51 = vld [vmem:[%s798_s5 + $0x8] sm:$0xff]  ;;  %v346_v61 = vpop.permute.xlu2 %345 }
 0x12b   :  { %v171_v6 = vmax.f32 %v162_v62, 0.0 }
 0x130   :  { %v163_v52 = vpop.f32.mrf.mxu1 }
 0x131   :  { %v164_v59 = vadd.f32 %v163_v52, %v123_v55 }
 0x133   :  { %v172_v1 = vmax.f32 %v164_v59, 0.0 }
 0x135   :  { %v176_v7 = vpack.c.bf16 %v172_v1, %v171_v6  ;;  %v341_v1 = vpop.permute.xlu2 %340 }
 0x138   :  { %v166_v54 = vpop.f32.mrf.mxu1 }
 0x139   :  { %v167_v56 = vadd.f32 %v166_v54, %v128_v53 }
 0x13b   :  { %v173_v63 = vmax.f32 %v167_v56, 0.0 }
 0x140   :  { %v168_v58 = vpop.f32.mrf.mxu1 }
 0x141   :  { %v169_v60 = vadd.f32 %v168_v58, %v133_v57 }
 0x143   :  { %v174_v0 = vmax.f32 %v169_v60, 0.0 }
 0x145   :  { %v177_v5 = vpack.c.bf16 %v174_v0, %v173_v63  ;;  %v351_v0 = vpop.permute.xlu0 %350 }
 0x147   :  { %193 = vmatpush.bf16.msra.mxu2 %v177_v5 }
 0x14b   :  { %194 = vmatpush.bf16.msra.mxu2 %v176_v7 }
 0x14e   :  { %492 = vmatmul.msk.bf16.vlgmr.msra.gmra.mxu2 %vm145_vm1, %v175_v8 }
 0x1d1   :  { %v196_v17 = vpop.f32.mrf.mxu2 }
 0x1d2   :  { %v764_v19 = vadd.f32 %v196_v17, %v182_v12 }
 0x1d4   :  { %vm200_vm2 = vcmp.ge.f32.partialorder %v764_v19, 0.0  ;;  %v493_v20 = vmul.f32 -1.442695, %v764_v19 }
 0x1d5   :  { %v494_v22 = vsel %vm200_vm2, 1.0, %v597_v21 }
 0x1d6   :  { %540 = vpow2.f32 %v493_v20  ;;  %v251_v23 = vperm.slane %v494_v22, 0  ;;  %v221_v20 = vsel %vm200_vm2, 1, %v596_v3  ;;  %v401_v22 = vpop.permute.xlu0 %400 }
 0x1d7   :  { %v432_v21 = vperm.slane %v221_v20, 0 }
 0x1d8   :  { %v255_v24 = vmul.f32 %v251_v23, %v249_v13  ;;  %v254_v25 = vmul.f32 %v251_v23, %v244_v11  ;;  %v252_v26 = vmul.f32 %v251_v23, %v234_v16  ;;  %v253_v29 = vmul.f32 %v251_v23, %v239_v15 }
 0x1d9   :  { %v198_v28 = vpop.f32.mrf.mxu2  ;;  %vm433_vm7 = vcmp.eq.s32.totalorder %v432_v21, 1 }
 0x1da   :  { %v289_v30 = vadd.f32 %v288_v27, %v255_v24  ;;  %v287_v31 = vadd.f32 %v286_v14, %v254_v25  ;;  %v282_v32 = vadd.f32 %v281_v9, %v252_v26  ;;  %v284_v35 = vadd.f32 %v283_v10, %v253_v29  ;;  %v336_v10 = vpop.permute.xlu1 %335 }
 0x1dc   :  { %v541_v36 = vpop.eup %540  ;;  %v318_v38 = vadd.f32 %v313_v34, %v289_v30  ;;  %v317_v39 = vadd.f32 %v308_v18, %v287_v31  ;;  %v315_v40 = vadd.f32 %v298_v33, %v282_v32  ;;  %v316_v42 = vadd.f32 %v303_v37, %v284_v35  ;;  %v528_v18 = vld [vmem:[%s799_s6] sm:$0xff]  ;;  %s599_s6 = smov [#allocation2]  }
 0x1dd   :  { %v204_v41 = vadd.f32 1.0, %v541_v36  ;;  %s442_s11 = sshll.u32 %s599_s6, 4  ;;  %s443_s11 = int_to_ptr.vmem [resolvable:$true] %s442_s11 }
 0x1de   :  { %v322_v43 = vmax.f32 %v318_v38, 0.0  ;;  %v321_v44 = vmax.f32 %v317_v39, 0.0  ;;  %v319_v46 = vmax.f32 %v315_v40, 0.0  ;;  %v320_v47 = vmax.f32 %v316_v42, 0.0 }
 0x1df   :  { %542 = vrcp.f32 %v204_v41  ;;  %v216_v54 = vand.u32 2147483648, %v204_v41  ;;  %v214_v56 = vand.u32 2147483647, %v204_v41  ;;  %vm210_vm4 = vweird.f32 %v204_v41 }
 0x1e0   :  { %v328_v45 = vpack.c.bf16 %v322_v43, %v321_v44  ;;  %v327_v48 = vpack.c.bf16 %v320_v47, %v319_v46 }
 0x1e1   :  { %v217_v58 = vor.u32 1.1754944e-38, %v216_v54  ;;  %vm215_vm6 = vcmp.eq.f32.partialorder %v214_v56, 8.507059e+37 }
 0x1e2   :  { %375 = vmatpush.bf16.msrb.mxu2 %v328_v45  ;;  %529 = vmatpush.bf16.msrb.mxu3 %v328_v45  ;;  %v406_v26 = vpop.permute.xlu1 %405 }
 0x1e5   :  { %v543_v49 = vpop.eup %542 }
 0x1e6   :  { %376 = vmatpush.bf16.msrb.mxu2 %v327_v48  ;;  %530 = vmatpush.bf16.msrb.mxu3 %v327_v48  ;;  %v206_v52 = vmul.f32 %v543_v49, %v204_v41  ;;  %vm211_vm3 = vweird.f32 %v543_v49 }
 0x1e7   :  { %vm212_vm5 = vmor %vm210_vm4, %vm211_vm3 }
 0x1e8   :  { %v207_v53 = vsub.f32 1.0, %v206_v52 }
 0x1e9   :  { %513 = vmatmul.msk.bf16.vlgmr.msrb.gmra.mxu2 %vm145_vm1, %v526_v50  ;;  %514 = vmatmul.msk.bf16.vlgmr.msrb.gmra.mxu3 %vm145_vm1, %v527_v51 }
 0x1ea   :  { %v208_v55 = vmul.f32 %v543_v49, %v207_v53 }
 0x1ec   :  { %v209_v57 = vadd.f32 %v543_v49, %v208_v55 }
 0x1ee   :  { %v213_v59 = vsel %vm212_vm5, %v543_v49, %v209_v57 }
 0x1ef   :  { %v218_v60 = vsel %vm215_vm6, %v217_v58, %v213_v59 }
 0x1f0   :  { %220 = vst [vmem:[#allocation4] sm:$0x1] %v218_v60 }
 0x1f1   :  { %461 = dma.vmem_to_hbm [thread:$0]  %s457_s28, 16, %s459_s10, [#allocation5]  }
 0x26c   :  { %v378_v62 = vpop.f32.mrf.mxu2  ;;  %v383_v63 = vpop.f32.mrf.mxu3 }
 0x26d   :  { %v384_v5 = vadd.f32 %v383_v63, %v346_v61  ;;  %v379_v11 = vadd.f32 %v378_v62, %v336_v10 }
 0x26f   :  { %v390_v12 = vmax.f32 %v384_v5, 0.0  ;;  %v388_v16 = vmax.f32 %v379_v11, 0.0 }
 0x274   :  { %v380_v6 = vpop.f32.mrf.mxu2  ;;  %v385_v7 = vpop.f32.mrf.mxu3 }
 0x275   :  { %v381_v8 = vadd.f32 %v380_v6, %v341_v1  ;;  %v386_v9 = vadd.f32 %v385_v7, %v351_v0 }
 0x277   :  { %v391_v13 = vmax.f32 %v386_v9, 0.0  ;;  %v389_v14 = vmax.f32 %v381_v8, 0.0 }
 0x279   :  { %v395_v15 = vpack.c.bf16 %v391_v13, %v390_v12  ;;  %v394_v17 = vpack.c.bf16 %v389_v14, %v388_v16 }
 0x27b   :  { %422 = vmatpush.bf16.msrb.mxu0 %v395_v15 }
 0x27f   :  { %423 = vmatpush.bf16.msrb.mxu0 %v394_v17 }
 0x282   :  { %519 = vmatmul.msk.bf16.vlgmr.msrb.gmra.mxu0 %vm145_vm1, %v528_v18 }
 0x2ff   :  { %v425_v23 = vpop.f32.mrf.mxu0 }
 0x300   :  { %v426_v24 = vadd.f32 %v425_v23, %v401_v22 }
 0x302   :  { %v434_v25 = vsel %vm433_vm7, %v661_v2, %v426_v24 }
 0x303   :  { %436 = vst [vmem:[#allocation2] sm:$0xff] %v434_v25 }
 0x307   :  { %v427_v27 = vpop.f32.mrf.mxu0 }
 0x308   :  { %v428_v28 = vadd.f32 %v427_v27, %v406_v26 }
 0x30a   :  { %v435_v3 = vsel %vm433_vm7, %v668_v4, %v428_v28 }
 0x30b   :  { %437 = vst [vmem:[#allocation2 + $0x8] sm:$0xff] %v435_v3 }
 0x30c   :  { %450 = dma.vmem_to_hbm [thread:$0]  %s443_s11, 256, %s445_s9, [#allocation3], %s600_s14, %s600_s14, %s601_s1  }
 0x30d   :  { %592 = dma.done.wait [#allocation3], 256  }
 0x30e   :  { %593 = vsyncadd [#allocation3], 4294967040 }
 0x30f   :  { %594 = dma.done.wait [#allocation5], 16  }
 0x310   :  { %595 = vsyncadd [#allocation5], 4294967280 }
 0x311   :  { %470 = vsyncpa [#allocation3], 1 }
 0x312   :  { %471 = vsyncpa [#allocation5], 1 }

</bundles_post_ra>
